<compile_context>
chip_gen: v7x
topology: tpu7x:2x2x1
jax: 0.10.0
libtpu: 0.0.40
codegen_flags: <defaults>
</compile_context>

<pallas_src>
import functools

import jax
import jax.numpy as jnp
import numpy as np
from jax.experimental import pallas as pl
from jax.experimental.pallas import tpu as pltpu

EPS = 1e-5  # nn.InstanceNorm2d default


def _round_up(x, m):
    return ((x + m - 1) // m) * m


def _tensorcores_per_chip():
    """2 TensorCores per chip on v7x (and megacore v3/v4); 1 on v5e/v6e."""
    try:
        kind = jax.devices()[0].device_kind.lower()
    except Exception:
        return 1
    if "v7" in kind or "tpu7" in kind:
        return 2
    if "v4" in kind or "v3" in kind:
        return 2
    return 1


def _choose_nb(n, per_sample_bytes, tcs, samples_per_block):
    """Samples per grid step: as many as VMEM allows (single-TC), but keep at
    least `tcs` parallel grid steps on multi-TC chips."""
    budget = 40 * 1024 * 1024  # conservative; fits v7x's 64 MiB with headroom
    max_nb = min(n, samples_per_block, max(1, budget // max(per_sample_bytes, 1)))
    if tcs >= 2 and n >= 2:
        max_nb = min(max_nb, max(1, n // tcs))
    nb = 1
    for d in range(1, max_nb + 1):
        if n % d == 0:
            nb = d
    return nb


def _glu_conv_kernel(x_ref, w_ref, m_ref, p_ref, o_ref, rhs_ref, *,
                     taps, c_out, c4p, l_acc):
    """Per grid step: nb samples, one fused matmul.
    x_ref:   [nb, C4p, L_pad]  bf16  (space-to-depth'd, zero-padded input)
    w_ref:   [2*C_out, Q*C4p]  bf16  (fused conv+gate per-tap weights, flattened over K)
    m_ref:   [1, L_acc]        f32   (valid-position mask already divided by P)
    p_ref:   [2*C_out, 2]      f32   (col 0 = gamma, col 1 = beta; conv rows then gate rows)
    o_ref:   [nb, C_out, L_acc] bf16 (lane-dense NCHW-flat output)
    rhs_ref: [Q*C4p, nb*L_acc] bf16  VMEM scratch (deep matmul RHS)
    """
    nb = o_ref.shape[0]

    # Pack the Q shifted tap slices of every sample into one deep RHS.
    for b in range(nb):                                    # static unroll (small nb)
        xb = x_ref[b]                                      # [C4p, L_pad] bf16
        for q, d in enumerate(taps):                       # static unroll (small Q)
            rhs_ref[q * c4p:(q + 1) * c4p,
                    b * l_acc:(b + 1) * l_acc] = xb[:, d:d + l_acc]

    # Single MXU matmul for conv + gate over all taps and all samples.
    acc = jnp.dot(w_ref[...], rhs_ref[...],
                  preferred_element_type=jnp.float32)      # [2*C_out, nb*L_acc] f32

    mask_div_p = m_ref[...]                                # [1, L_acc]
    p = p_ref[...]
    gamma = p[:, 0:1]                                      # [2*C_out, 1]
    beta = p[:, 1:2]

    for b in range(nb):                                    # per-sample InstanceNorm + GLU
        a = acc[:, b * l_acc:(b + 1) * l_acc]              # lane-aligned static slice
        am = a * mask_div_p
        mean = jnp.sum(am, axis=1, keepdims=True)          # [2*C_out, 1]
        ex2 = jnp.sum(am * a, axis=1, keepdims=True)
        var = jnp.maximum(ex2 - mean * mean, 0.0)          # biased variance over P valid pos
        y = (a - mean) * (jax.lax.rsqrt(var + EPS) * gamma) + beta
        h = y[:c_out]                                      # conv branch
        g = y[c_out:]                                      # gate branch
        o_ref[b] = (h * jax.nn.sigmoid(g)).astype(o_ref.dtype)


def _phase_weights(w, stride):
    """torch conv weight [C_out, C_in, kh, kw] -> per-tap phase weights
    [Q, C_out, C_in*stride*stride] for the space-to-depth formulation."""
    c_out, c_in, kh, kw = w.shape
    s = stride
    khq = -(-kh // s)
    kwq = -(-kw // s)
    wph = jnp.zeros((khq, kwq, c_out, c_in, s, s), w.dtype)
    for qi in range(khq):
        for qj in range(kwq):
            for ri in range(s):
                for rj in range(s):
                    ki, kj = s * qi + ri, s * qj + rj
                    if ki < kh and kj < kw:
                        wph = wph.at[qi, qj, :, :, ri, rj].set(w[:, :, ki, kj])
    return wph.reshape(khq * kwq, c_out, c_in * s * s)


def down_sample_generator(x, params, kernel_size, stride, padding,
                          samples_per_block=64, out_dtype=jnp.float32):
    """x: [N, C_in, H, W] float32 -> [N, C_out, H_out, W_out] out_dtype."""
    kh = kw = kernel_size
    s = stride
    N, C_in, H, W = x.shape
    C_out = params["w_conv"].shape[0]

    Ho = (H + 2 * padding - kh) // s + 1
    Wo = (W + 2 * padding - kw) // s + 1

    # ---- bf16 cast FIRST, then single space-to-depth pass (half the HBM traffic) ----
    Hp = _round_up(H + 2 * padding, s)
    Wp = _round_up(W + 2 * padding, s)
    xb16 = x.astype(jnp.bfloat16)
    xp = jnp.pad(xb16, ((0, 0), (0, 0),
                        (padding, Hp - H - padding),
                        (padding, Wp - W - padding)))
    Hp2, Wp2 = Hp // s, Wp // s
    C4 = C_in * s * s
    C4p = _round_up(C4, 8)                                 # sublane-aligned K chunk
    xph = xp.reshape(N, C_in, Hp2, s, Wp2, s).transpose(0, 1, 3, 5, 2, 4)
    xflat = xph.reshape(N, C4, Hp2 * Wp2)

    khq = -(-kh // s)
    kwq = -(-kw // s)
    taps = tuple(qi * Wp2 + qj for qi in range(khq) for qj in range(kwq))
    Q = len(taps)

    L_acc = _round_up(Ho * Wp2, 128)                       # lane-dense output width
    L_pad = _round_up(max(Hp2 * Wp2, max(taps) + L_acc), 128)
    xflat = jnp.pad(xflat, ((0, 0), (0, C4p - C4), (0, L_pad - Hp2 * Wp2)))

    # ---- fused conv+gate weight, flattened to one [2*C_out, Q*C4p] operand ----
    # (conv bias dropped: a per-channel constant is cancelled by InstanceNorm)
    w_all = jnp.concatenate(
        [_phase_weights(params["w_conv"], s),
         _phase_weights(params["w_gate"], s)], axis=1)     # [Q, 2*C_out, C4]
    w_all = jnp.pad(w_all, ((0, 0), (0, 0), (0, C4p - C4)))
    w_flat = jnp.transpose(w_all, (1, 0, 2)).reshape(2 * C_out, Q * C4p)
    w_flat = w_flat.astype(jnp.bfloat16)

    # ---- packed per-channel affine params ----
    gamma = jnp.concatenate([params["gamma_conv"], params["gamma_gate"]])
    beta = jnp.concatenate([params["beta_conv"], params["beta_gate"]])
    gb = jnp.stack([gamma, beta], axis=1).astype(jnp.float32)   # [2*C_out, 2]

    # ---- valid-position mask folded with 1/P (compile-time constant) ----
    l_idx = np.arange(L_acc)
    valid = (l_idx % Wp2 < Wo) & (l_idx < Ho * Wp2)
    mask_div_p = jnp.asarray(
        (valid[None, :].astype(np.float64) / float(Ho * Wo)).astype(np.float32))

    # ---- pick samples-per-step from a VMEM budget + TC-count constraint ----
    per_sample = (2 * C4p * L_pad * 2          # double-buffered bf16 input block
                  + 2 * C_out * L_acc * 2      # double-buffered bf16 output block
                  + Q * C4p * L_acc * 2        # RHS scratch slice (bf16, single-buffered)
                  + 2 * C_out * L_acc * 4)     # live f32 accumulator
    nb = _choose_nb(N, per_sample, _tensorcores_per_chip(), samples_per_block)
    grid = (N // nb,)

    fixed = Q * C4p * 2 * C_out * 2 * 2 + (L_acc * 4 + 2 * C_out * 2 * 4) * 2
    vmem_limit = int(min(max(2 * (nb * per_sample + fixed), 32 << 20), 48 << 20))

    kernel = functools.partial(_glu_conv_kernel, taps=taps, c_out=C_out,
                               c4p=C4p, l_acc=L_acc)

    out = pl.pallas_call(
        kernel,
        out_shape=jax.ShapeDtypeStruct((N, C_out, L_acc), jnp.bfloat16),
        grid_spec=pltpu.PrefetchScalarGridSpec(
            num_scalar_prefetch=0,
            grid=grid,
            in_specs=[
                pl.BlockSpec((nb, C4p, L_pad), lambda n: (n, 0, 0)),
                pl.BlockSpec((2 * C_out, Q * C4p), lambda n: (0, 0)),
                pl.BlockSpec((1, L_acc), lambda n: (0, 0)),
                pl.BlockSpec((2 * C_out, 2), lambda n: (0, 0)),
            ],
            out_specs=pl.BlockSpec((nb, C_out, L_acc), lambda n: (n, 0, 0)),
            scratch_shapes=[pltpu.VMEM((Q * C4p, nb * L_acc), jnp.bfloat16)],
        ),
        compiler_params=pltpu.CompilerParams(
            dimension_semantics=("parallel",),
            vmem_limit_bytes=vmem_limit),
    )(xflat, w_flat, mask_div_p, gb)

    # NCHW-native: drop padded columns (fused into one slice copy), cast to out_dtype.
    out = out[:, :, :Ho * Wp2].reshape(N, C_out, Ho, Wp2)[:, :, :, :Wo]
    return out.astype(out_dtype)


def init_params(key, in_channels, out_channels, kernel_size):
    ks = jax.random.split(key, 8)
    wshape = (out_channels, in_channels, kernel_size, kernel_size)
    scale = 0.1
    return {
        "w_conv": scale * jax.random.normal(ks[0], wshape, jnp.float32),
        "b_conv": scale * jax.random.normal(ks[1], (out_channels,), jnp.float32),
        "w_gate": scale * jax.random.normal(ks[2], wshape, jnp.float32),
        "b_gate": scale * jax.random.normal(ks[3], (out_channels,), jnp.float32),
        "gamma_conv": 1.0 + scale * jax.random.normal(ks[4], (out_channels,), jnp.float32),
        "beta_conv": scale * jax.random.normal(ks[5], (out_channels,), jnp.float32),
        "gamma_gate": 1.0 + scale * jax.random.normal(ks[6], (out_channels,), jnp.float32),
        "beta_gate": scale * jax.random.normal(ks[7], (out_channels,), jnp.float32),
    }


def _reference(x, params, kernel_size, stride, padding):
    """Pure-JAX f32 reference of the PyTorch forward (includes the conv bias,
    which InstanceNorm cancels — validating that the kernel may drop it)."""
    def branch(w, b, gamma, beta):
        y = jax.lax.conv_general_dilated(
            x, w, window_strides=(stride, stride),
            padding=[(padding, padding), (padding, padding)],
            dimension_numbers=("NCHW", "OIHW", "NCHW"))
        y = y + b[None, :, None, None]
        mean = jnp.mean(y, axis=(2, 3), keepdims=True)
        var = jnp.mean((y - mean) ** 2, axis=(2, 3), keepdims=True)
        y = (y - mean) / jnp.sqrt(var + EPS)
        return y * gamma[None, :, None, None] + beta[None, :, None, None]

    h = branch(params["w_conv"], params["b_conv"],
               params["gamma_conv"], params["beta_conv"])
    g = branch(params["w_gate"], params["b_gate"],
               params["gamma_gate"], params["beta_gate"])
    return h * jax.nn.sigmoid(g)


if __name__ == "__main__":
    # Small shapes consistent with the module: downsample 16x16 -> 8x8.
    N, C_in, H, W = 2, 4, 16, 16
    C_out, kernel_size, stride, padding = 8, 3, 2, 1

    key = jax.random.PRNGKey(0)
    kx, kp = jax.random.split(key)
    x = jax.random.normal(kx, (N, C_in, H, W), jnp.float32)
    params = init_params(kp, C_in, C_out, kernel_size)

    fwd = jax.jit(functools.partial(down_sample_generator,
                                    kernel_size=kernel_size,
                                    stride=stride,
                                    padding=padding))
    out = jax.block_until_ready(fwd(x, params))

    ref = _reference(x, params, kernel_size, stride, padding)
    assert out.shape == ref.shape == (N, C_out, H // stride, W // stride)
    # bf16 MXU operands and bf16 output (stats in f32) -> bf16-grade tolerance.
    assert jnp.allclose(out, ref, rtol=3e-2, atol=3e-2), "mismatch vs reference"

    print("KERNEL_OK")
</pallas_src>

<mosaic_0001>
module attributes {stable_mosaic.version = 11 : i64} {
  func.func @_glu_conv_kernel(%arg0: i32, %arg1: memref<2x16x256xbf16, #tpu.memory_space<vmem>>, %arg2: memref<16x64xbf16, #tpu.memory_space<vmem>>, %arg3: memref<1x128xf32, #tpu.memory_space<vmem>>, %arg4: memref<16x2xf32, #tpu.memory_space<vmem>>, %arg5: memref<2x8x128xbf16, #tpu.memory_space<vmem>>, %arg6: memref<64x256xbf16, #tpu.memory_space<vmem>>) attributes {dimension_semantics = [#tpu.dimension_semantics<parallel>], iteration_bounds = array<i64: 1>, scalar_prefetch = 0 : i64, scratch_operands = 1 : i64, tpu.core_type = #tpu.core_type<tc>, window_params = [{transform_indices = @transform_0, window_bounds = array<i64: 2, 16, 256>}, {pipeline_mode = #tpu.pipeline_mode<synchronous>, transform_indices = @transform_1, window_bounds = array<i64: 16, 64>}, {pipeline_mode = #tpu.pipeline_mode<synchronous>, transform_indices = @transform_2, window_bounds = array<i64: 1, 128>}, {pipeline_mode = #tpu.pipeline_mode<synchronous>, transform_indices = @transform_3, window_bounds = array<i64: 16, 2>}, {transform_indices = @transform_4, window_bounds = array<i64: 2, 8, 128>}]} {
    %c0 = arith.constant 0 : index
    %c0_0 = arith.constant 0 : index
    %c0_1 = arith.constant 0 : index
    %0 = vector.load %arg1[%c0, %c0_0, %c0_1] : memref<2x16x256xbf16, #tpu.memory_space<vmem>>, vector<1x16x256xbf16>
    %1 = vector.shape_cast %0 : vector<1x16x256xbf16> to vector<16x256xbf16>
    %2 = vector.extract_strided_slice %1 {offsets = [0, 0], sizes = [16, 128], strides = [1, 1]} : vector<16x256xbf16> to vector<16x128xbf16>
    %c0_2 = arith.constant 0 : index
    %c0_3 = arith.constant 0 : index
    %3 = vector.load %arg6[%c0_2, %c0_3] : memref<64x256xbf16, #tpu.memory_space<vmem>>, vector<16x128xbf16>
    tpu.vector_store %arg6[%c0_2, %c0_3], %2 {strides = array<i32>} : memref<64x256xbf16, #tpu.memory_space<vmem>>, vector<16x128xbf16>,
    %4 = vector.extract_strided_slice %1 {offsets = [0, 1], sizes = [16, 128], strides = [1, 1]} : vector<16x256xbf16> to vector<16x128xbf16>
    %c16 = arith.constant 16 : index
    %c0_4 = arith.constant 0 : index
    %5 = vector.load %arg6[%c16, %c0_4] : memref<64x256xbf16, #tpu.memory_space<vmem>>, vector<16x128xbf16>
    tpu.vector_store %arg6[%c16, %c0_4], %4 {strides = array<i32>} : memref<64x256xbf16, #tpu.memory_space<vmem>>, vector<16x128xbf16>,
    %6 = vector.extract_strided_slice %1 {offsets = [0, 9], sizes = [16, 128], strides = [1, 1]} : vector<16x256xbf16> to vector<16x128xbf16>
    %c32 = arith.constant 32 : index
    %c0_5 = arith.constant 0 : index
    %7 = vector.load %arg6[%c32, %c0_5] : memref<64x256xbf16, #tpu.memory_space<vmem>>, vector<16x128xbf16>
    tpu.vector_store %arg6[%c32, %c0_5], %6 {strides = array<i32>} : memref<64x256xbf16, #tpu.memory_space<vmem>>, vector<16x128xbf16>,
    %8 = vector.extract_strided_slice %1 {offsets = [0, 10], sizes = [16, 128], strides = [1, 1]} : vector<16x256xbf16> to vector<16x128xbf16>
    %c48 = arith.constant 48 : index
    %c0_6 = arith.constant 0 : index
    %9 = vector.load %arg6[%c48, %c0_6] : memref<64x256xbf16, #tpu.memory_space<vmem>>, vector<16x128xbf16>
    tpu.vector_store %arg6[%c48, %c0_6], %8 {strides = array<i32>} : memref<64x256xbf16, #tpu.memory_space<vmem>>, vector<16x128xbf16>,
    %c1 = arith.constant 1 : index
    %c0_7 = arith.constant 0 : index
    %c0_8 = arith.constant 0 : index
    %10 = vector.load %arg1[%c1, %c0_7, %c0_8] : memref<2x16x256xbf16, #tpu.memory_space<vmem>>, vector<1x16x256xbf16>
    %11 = vector.shape_cast %10 : vector<1x16x256xbf16> to vector<16x256xbf16>
    %12 = vector.extract_strided_slice %11 {offsets = [0, 0], sizes = [16, 128], strides = [1, 1]} : vector<16x256xbf16> to vector<16x128xbf16>
    %c0_9 = arith.constant 0 : index
    %c128 = arith.constant 128 : index
    %13 = vector.load %arg6[%c0_9, %c128] : memref<64x256xbf16, #tpu.memory_space<vmem>>, vector<16x128xbf16>
    tpu.vector_store %arg6[%c0_9, %c128], %12 {strides = array<i32>} : memref<64x256xbf16, #tpu.memory_space<vmem>>, vector<16x128xbf16>,
    %14 = vector.extract_strided_slice %11 {offsets = [0, 1], sizes = [16, 128], strides = [1, 1]} : vector<16x256xbf16> to vector<16x128xbf16>
    %c16_10 = arith.constant 16 : index
    %c128_11 = arith.constant 128 : index
    %15 = vector.load %arg6[%c16_10, %c128_11] : memref<64x256xbf16, #tpu.memory_space<vmem>>, vector<16x128xbf16>
    tpu.vector_store %arg6[%c16_10, %c128_11], %14 {strides = array<i32>} : memref<64x256xbf16, #tpu.memory_space<vmem>>, vector<16x128xbf16>,
    %16 = vector.extract_strided_slice %11 {offsets = [0, 9], sizes = [16, 128], strides = [1, 1]} : vector<16x256xbf16> to vector<16x128xbf16>
    %c32_12 = arith.constant 32 : index
    %c128_13 = arith.constant 128 : index
    %17 = vector.load %arg6[%c32_12, %c128_13] : memref<64x256xbf16, #tpu.memory_space<vmem>>, vector<16x128xbf16>
    tpu.vector_store %arg6[%c32_12, %c128_13], %16 {strides = array<i32>} : memref<64x256xbf16, #tpu.memory_space<vmem>>, vector<16x128xbf16>,
    %18 = vector.extract_strided_slice %11 {offsets = [0, 10], sizes = [16, 128], strides = [1, 1]} : vector<16x256xbf16> to vector<16x128xbf16>
    %c48_14 = arith.constant 48 : index
    %c128_15 = arith.constant 128 : index
    %19 = vector.load %arg6[%c48_14, %c128_15] : memref<64x256xbf16, #tpu.memory_space<vmem>>, vector<16x128xbf16>
    tpu.vector_store %arg6[%c48_14, %c128_15], %18 {strides = array<i32>} : memref<64x256xbf16, #tpu.memory_space<vmem>>, vector<16x128xbf16>,
    %c0_16 = arith.constant 0 : index
    %c0_17 = arith.constant 0 : index
    %20 = vector.load %arg2[%c0_16, %c0_17] : memref<16x64xbf16, #tpu.memory_space<vmem>>, vector<16x64xbf16>
    %c0_18 = arith.constant 0 : index
    %c0_19 = arith.constant 0 : index
    %21 = vector.load %arg6[%c0_18, %c0_19] : memref<64x256xbf16, #tpu.memory_space<vmem>>, vector<64x256xbf16>
    %cst = arith.constant dense<0.000000e+00> : vector<16x256xf32>
    %22 = tpu.matmul %20, %21, %cst {dimension_numbers = #tpu.dot_dimension_numbers<[1], [0], [0], [1], [0, 0, 1, 1], [], []>} : vector<16x64xbf16>, vector<64x256xbf16>, vector<16x256xf32> -> vector<16x256xf32>
    %c0_20 = arith.constant 0 : index
    %c0_21 = arith.constant 0 : index
    %23 = vector.load %arg3[%c0_20, %c0_21] : memref<1x128xf32, #tpu.memory_space<vmem>>, vector<1x128xf32>
    %c0_22 = arith.constant 0 : index
    %c0_23 = arith.constant 0 : index
    %24 = vector.load %arg4[%c0_22, %c0_23] : memref<16x2xf32, #tpu.memory_space<vmem>>, vector<16x2xf32>
    %25 = vector.extract_strided_slice %24 {offsets = [0, 0], sizes = [16, 1], strides = [1, 1]} : vector<16x2xf32> to vector<16x1xf32>
    %26 = vector.extract_strided_slice %24 {offsets = [0, 1], sizes = [16, 1], strides = [1, 1]} : vector<16x2xf32> to vector<16x1xf32>
    %27 = vector.extract_strided_slice %22 {offsets = [0, 0], sizes = [16, 128], strides = [1, 1]} : vector<16x256xf32> to vector<16x128xf32>
    %28 = vector.broadcast %23 : vector<1x128xf32> to vector<16x128xf32>
    %29 = arith.mulf %27, %28 : vector<16x128xf32>
    %cst_24 = arith.constant dense<0.000000e+00> : vector<16xf32>
    %30 = vector.multi_reduction <add>, %29, %cst_24 [1] : vector<16x128xf32> to vector<16xf32>
    %31 = vector.shape_cast %30 : vector<16xf32> to vector<16x1xf32>
    %32 = arith.mulf %29, %27 : vector<16x128xf32>
    %cst_25 = arith.constant dense<0.000000e+00> : vector<16xf32>
    %33 = vector.multi_reduction <add>, %32, %cst_25 [1] : vector<16x128xf32> to vector<16xf32>
    %34 = vector.shape_cast %33 : vector<16xf32> to vector<16x1xf32>
    %35 = arith.mulf %31, %31 : vector<16x1xf32>
    %36 = arith.subf %34, %35 : vector<16x1xf32>
    %cst_26 = arith.constant 0.000000e+00 : f32
    %37 = vector.broadcast %cst_26 : f32 to vector<16x1xf32>
    %38 = arith.maximumf %36, %37 : vector<16x1xf32>
    %39 = vector.broadcast %31 : vector<16x1xf32> to vector<16x128xf32>
    %40 = arith.subf %27, %39 : vector<16x128xf32>
    %cst_27 = arith.constant 9.99999974E-6 : f32
    %41 = vector.broadcast %cst_27 : f32 to vector<16x1xf32>
    %42 = arith.addf %38, %41 : vector<16x1xf32>
    %43 = math.rsqrt %42 : vector<16x1xf32>
    %44 = arith.mulf %43, %25 : vector<16x1xf32>
    %45 = vector.broadcast %44 : vector<16x1xf32> to vector<16x128xf32>
    %46 = arith.mulf %40, %45 : vector<16x128xf32>
    %47 = vector.broadcast %26 : vector<16x1xf32> to vector<16x128xf32>
    %48 = arith.addf %46, %47 : vector<16x128xf32>
    %49 = vector.extract_strided_slice %48 {offsets = [0, 0], sizes = [8, 128], strides = [1, 1]} : vector<16x128xf32> to vector<8x128xf32>
    %50 = vector.extract_strided_slice %48 {offsets = [8, 0], sizes = [8, 128], strides = [1, 1]} : vector<16x128xf32> to vector<8x128xf32>
    %51 = arith.negf %50 : vector<8x128xf32>
    %52 = math.exp %51 : vector<8x128xf32>
    %cst_28 = arith.constant 1.000000e+00 : f32
    %53 = vector.broadcast %cst_28 : f32 to vector<8x128xf32>
    %54 = arith.addf %53, %52 : vector<8x128xf32>
    %55 = arith.divf %53, %54 : vector<8x128xf32>
    %56 = arith.mulf %49, %55 : vector<8x128xf32>
    %57 = arith.truncf %56 : vector<8x128xf32> to vector<8x128xbf16>
    %c0_29 = arith.constant 0 : index
    %c0_30 = arith.constant 0 : index
    %c0_31 = arith.constant 0 : index
    %58 = vector.load %arg5[%c0_29, %c0_30, %c0_31] : memref<2x8x128xbf16, #tpu.memory_space<vmem>>, vector<1x8x128xbf16>
    %59 = vector.shape_cast %58 : vector<1x8x128xbf16> to vector<8x128xbf16>
    %60 = vector.shape_cast %57 : vector<8x128xbf16> to vector<1x8x128xbf16>
    tpu.vector_store %arg5[%c0_29, %c0_30, %c0_31], %60 {strides = array<i32>} : memref<2x8x128xbf16, #tpu.memory_space<vmem>>, vector<1x8x128xbf16>,
    %61 = vector.extract_strided_slice %22 {offsets = [0, 128], sizes = [16, 128], strides = [1, 1]} : vector<16x256xf32> to vector<16x128xf32>
    %62 = vector.broadcast %23 : vector<1x128xf32> to vector<16x128xf32>
    %63 = arith.mulf %61, %62 : vector<16x128xf32>
    %cst_32 = arith.constant dense<0.000000e+00> : vector<16xf32>
    %64 = vector.multi_reduction <add>, %63, %cst_32 [1] : vector<16x128xf32> to vector<16xf32>
    %65 = vector.shape_cast %64 : vector<16xf32> to vector<16x1xf32>
    %66 = arith.mulf %63, %61 : vector<16x128xf32>
    %cst_33 = arith.constant dense<0.000000e+00> : vector<16xf32>
    %67 = vector.multi_reduction <add>, %66, %cst_33 [1] : vector<16x128xf32> to vector<16xf32>
    %68 = vector.shape_cast %67 : vector<16xf32> to vector<16x1xf32>
    %69 = arith.mulf %65, %65 : vector<16x1xf32>
    %70 = arith.subf %68, %69 : vector<16x1xf32>
    %cst_34 = arith.constant 0.000000e+00 : f32
    %71 = vector.broadcast %cst_34 : f32 to vector<16x1xf32>
    %72 = arith.maximumf %70, %71 : vector<16x1xf32>
    %73 = vector.broadcast %65 : vector<16x1xf32> to vector<16x128xf32>
    %74 = arith.subf %61, %73 : vector<16x128xf32>
    %cst_35 = arith.constant 9.99999974E-6 : f32
    %75 = vector.broadcast %cst_35 : f32 to vector<16x1xf32>
    %76 = arith.addf %72, %75 : vector<16x1xf32>
    %77 = math.rsqrt %76 : vector<16x1xf32>
    %78 = arith.mulf %77, %25 : vector<16x1xf32>
    %79 = vector.broadcast %78 : vector<16x1xf32> to vector<16x128xf32>
    %80 = arith.mulf %74, %79 : vector<16x128xf32>
    %81 = vector.broadcast %26 : vector<16x1xf32> to vector<16x128xf32>
    %82 = arith.addf %80, %81 : vector<16x128xf32>
    %83 = vector.extract_strided_slice %82 {offsets = [0, 0], sizes = [8, 128], strides = [1, 1]} : vector<16x128xf32> to vector<8x128xf32>
    %84 = vector.extract_strided_slice %82 {offsets = [8, 0], sizes = [8, 128], strides = [1, 1]} : vector<16x128xf32> to vector<8x128xf32>
    %85 = arith.negf %84 : vector<8x128xf32>
    %86 = math.exp %85 : vector<8x128xf32>
    %cst_36 = arith.constant 1.000000e+00 : f32
    %87 = vector.broadcast %cst_36 : f32 to vector<8x128xf32>
    %88 = arith.addf %87, %86 : vector<8x128xf32>
    %89 = arith.divf %87, %88 : vector<8x128xf32>
    %90 = arith.mulf %83, %89 : vector<8x128xf32>
    %91 = arith.truncf %90 : vector<8x128xf32> to vector<8x128xbf16>
    %c1_37 = arith.constant 1 : index
    %c0_38 = arith.constant 0 : index
    %c0_39 = arith.constant 0 : index
    %92 = vector.load %arg5[%c1_37, %c0_38, %c0_39] : memref<2x8x128xbf16, #tpu.memory_space<vmem>>, vector<1x8x128xbf16>
    %93 = vector.shape_cast %92 : vector<1x8x128xbf16> to vector<8x128xbf16>
    %94 = vector.shape_cast %91 : vector<8x128xbf16> to vector<1x8x128xbf16>
    tpu.vector_store %arg5[%c1_37, %c0_38, %c0_39], %94 {strides = array<i32>} : memref<2x8x128xbf16, #tpu.memory_space<vmem>>, vector<1x8x128xbf16>,
    return
  }
  func.func @transform_0(%arg0: i32) -> (i32, i32, i32) {
    %c0_i32 = arith.constant 0 : i32
    %c0_i32_0 = arith.constant 0 : i32
    %c0_i32_1 = arith.constant 0 : i32
    return %arg0, %c0_i32, %c0_i32_0 : i32, i32, i32
  }
  func.func @transform_1(%arg0: i32) -> (i32, i32) {
    %c0_i32 = arith.constant 0 : i32
    %c0_i32_0 = arith.constant 0 : i32
    %c0_i32_1 = arith.constant 0 : i32
    return %c0_i32, %c0_i32_0 : i32, i32
  }
  func.func @transform_2(%arg0: i32) -> (i32, i32) {
    %c0_i32 = arith.constant 0 : i32
    %c0_i32_0 = arith.constant 0 : i32
    %c0_i32_1 = arith.constant 0 : i32
    return %c0_i32, %c0_i32_0 : i32, i32
  }
  func.func @transform_3(%arg0: i32) -> (i32, i32) {
    %c0_i32 = arith.constant 0 : i32
    %c0_i32_0 = arith.constant 0 : i32
    %c0_i32_1 = arith.constant 0 : i32
    return %c0_i32, %c0_i32_0 : i32, i32
  }
  func.func @transform_4(%arg0: i32) -> (i32, i32, i32) {
    %c0_i32 = arith.constant 0 : i32
    %c0_i32_0 = arith.constant 0 : i32
    %c0_i32_1 = arith.constant 0 : i32
    return %arg0, %c0_i32, %c0_i32_0 : i32, i32, i32
  }
}

</mosaic_0001>

<bundles_post_ra>
// kernel: down_sample_generator.1
= control target key start
LH: loop header
LB: loop body
LE: loop exit
PB: predicated region body
PF: predicated region fallthrough
CT: control target
= control target key end

     0   :  { %s317_s19 = smov 127   ;;  %s318_s24 = smov 119   ;;  %v319_v4 = vmov 0   ;;  %vm34_vm0 = vcmask 1039360   ;;  %vm42_vm1 = vcmask 973824   ;;  %vm50_vm2 = vcmask 965632   ;;  %s409_s0 = inlined_call_operand.vmem [shape: bf16[2,16,256], index: 0, kind: input, shape index: {}]   ;;  %s410_s1 = inlined_call_operand.vmem [shape: bf16[16,64], index: 1, kind: input, shape index: {}]   ;;  %s411_s2 = inlined_call_operand.vmem [shape: f32[1,128], index: 2, kind: input, shape index: {}]   ;;  %s412_s3 = inlined_call_operand.vmem [shape: f32[16,2], index: 3, kind: input, shape index: {}]   ;;  %s413_s4 = inlined_call_operand.vmem [shape: bf16[2,8,128], index: 4, kind: output, shape index: {}]  }
   0x1   :  { %v294_v0 = vld [vmem:[%s409_s0 + $0x10] ss:$8 sps:$4 sm:$0xff]   ;;  %v296_v1 = vld [vmem:[%s409_s0] ss:$8 sps:$4 sm:$0xff]   ;;  %v298_v2 = vld [vmem:[%s409_s0 + $0x14] ss:$8 sps:$4 sm:$0xff]   ;;  %139 = vmatprep.mubr.bf16.mxu0 %v319_v4  ;;  %289 = vset.pattern.permute.xlu1 %v319_v4 }
   0x2   :  { %67 = vrot.lane.b32.xlu0 %v294_v0, %s317_s19  ;;  %107 = vmatprep.subr.bf16.mxu0 %v294_v0  ;;  %v299_v3 = vld [vmem:[%s409_s0 + $0x4] ss:$8 sps:$4 sm:$0xff]   ;;  %s320_s25 = smov 118   ;;  %vm103_vm3 = vcmask 523264   ;;  %v280_v27 = vld [vmem:[%s411_s2] ss:$0 sm:$0xff] }
   0x3   :  { %30 = vrot.lane.b32.xlu1 %v296_v1, %s317_s19  ;;  %108 = vmatpush1.bf16.msra.mxu0 %v296_v1  ;;  %v300_v23 = vld [vmem:[%s410_s1] sm:$0xff]  }
   0x4   :  { %290 = vset.pattern.permute.xlu0 %v319_v4 }
   0x6   :  { %69 = vrot.lane.b32.xlu0 %v298_v2, %s317_s19 }
   0x7   :  { %32 = vrot.lane.b32.xlu1 %v299_v3, %s317_s19 }
   0xa   :  { %74 = vrot.lane.b32.xlu0 %v294_v0, %s318_s24 }
   0xb   :  { %76 = vrot.lane.b32.xlu1 %v298_v2, %s318_s24 }
   0xe   :  { %38 = vrot.lane.b32.xlu0 %v296_v1, %s318_s24 }
   0xf   :  { %40 = vrot.lane.b32.xlu1 %v299_v3, %s318_s24 }
  0x12   :  { %81 = vrot.lane.b32.xlu0 %v294_v0, %s320_s25  ;;  %v152_v0 = vld [vmem:[%s412_s3 + $0x8] sm:$0xff] }
  0x13   :  { %83 = vrot.lane.b32.xlu1 %v298_v2, %s320_s25 }
  0x16   :  { %46 = vrot.lane.b32.xlu0 %v296_v1, %s320_s25 }
  0x17   :  { %48 = vrot.lane.b32.xlu1 %v299_v3, %s320_s25 }
  0x74   :  { %v68_v5 = vpop.permute.xlu0 %67 }
  0x75   :  { %v31_v6 = vpop.permute.xlu1 %30 }
  0x78   :  { %v70_v7 = vpop.permute.xlu0 %69 }
  0x79   :  { %v33_v8 = vpop.permute.xlu1 %32  ;;  %v71_v9 = vsel %vm34_vm0, %v68_v5, %v70_v7  ;;  %v321_v7 = vmov 1  }
  0x7a   :  { %109 = vmatprep.subr.bf16.mxu0 %v71_v9  ;;  %v35_v10 = vsel %vm34_vm0, %v31_v6, %v33_v8  ;;  %v151_v9 = vld [vmem:[%s412_s3] sm:$0xff] }
  0x7b   :  { %110 = vmatpush1.bf16.msra.mxu0 %v35_v10 }
  0x7c   :  { %v75_v11 = vpop.permute.xlu0 %74 }
  0x7d   :  { %v77_v12 = vpop.permute.xlu1 %76 }
  0x7e   :  { %v78_v13 = vsel %vm42_vm1, %v75_v11, %v77_v12 }
  0x7f   :  { %111 = vmatprep.subr.bf16.mxu0 %v78_v13 }
  0x80   :  { %v39_v14 = vpop.permute.xlu0 %38 }
  0x81   :  { %v41_v15 = vpop.permute.xlu1 %40 }
  0x82   :  { %v43_v16 = vsel %vm42_vm1, %v39_v14, %v41_v15 }
  0x83   :  { %112 = vmatpush1.bf16.msra.mxu0 %v43_v16 }
  0x84   :  { %v82_v17 = vpop.permute.xlu0 %81 }
  0x85   :  { %v84_v18 = vpop.permute.xlu1 %83 }
  0x86   :  { %v85_v19 = vsel %vm50_vm2, %v82_v17, %v84_v18 }
  0x87   :  { %113 = vmatprep.subr.bf16.mxu0 %v85_v19 }
  0x88   :  { %v47_v20 = vpop.permute.xlu0 %46 }
  0x89   :  { %v49_v21 = vpop.permute.xlu1 %48 }
  0x8a   :  { %v51_v22 = vsel %vm50_vm2, %v47_v20, %v49_v21 }
  0x8b   :  { %114 = vmatpush1.bf16.msra.mxu0 %v51_v22 }
  0x8e   :  { %279 = vmatmul.mubr.msk.bf16.vlgmr.msra.gmra.mrb[0].mxu0 %vm103_vm3, %v300_v23 }
 0x161   :  { %v365_v24 = vpop.f32.mrb[0].mxu0 }
 0x162   :  { %v367_v25 = vpop.f32.mrb[1].mxu0  ;;  %v159_v32 = vmul.f32 %v280_v27, %v365_v24 }
 0x163   :  { %v369_v26 = vpop.f32.mrb[2].mxu0  ;;  %v218_v35 = vmul.f32 %v280_v27, %v367_v25 }
 0x164   :  { %v374_v28 = vpop.f32.mrb[3].mxu0  ;;  %v160_v29 = vmul.f32 %v280_v27, %v369_v26  ;;  %v165_v34 = vmul.f32 %v159_v32, %v365_v24 }
 0x165   :  { %v219_v30 = vmul.f32 %v280_v27, %v374_v28  ;;  %v224_v36 = vmul.f32 %v218_v35, %v367_v25 }
 0x166   :  { %163 = vadd.xlane.f32.xlu0 %v160_v29  ;;  %v166_v31 = vmul.f32 %v160_v29, %v369_v26 }
 0x167   :  { %222 = vadd.xlane.f32.xlu1 %v219_v30  ;;  %v225_v33 = vmul.f32 %v219_v30, %v374_v28 }
 0x16a   :  { %169 = vadd.xlane.f32.xlu0 %v166_v31 }
 0x16b   :  { %161 = vadd.xlane.f32.xlu1 %v159_v32 }
 0x16e   :  { %228 = vadd.xlane.f32.xlu0 %v225_v33 }
 0x16f   :  { %167 = vadd.xlane.f32.xlu1 %v165_v34 }
 0x172   :  { %220 = vadd.xlane.f32.xlu0 %v218_v35 }
 0x176   :  { %226 = vadd.xlane.f32.xlu0 %v224_v36 }
 0x1f3   :  { %v164_v37 = vpop.xlane.xlu0 %163 }
 0x1f4   :  { %v178_v38 = vsub.f32 %v369_v26, %v164_v37  ;;  %v223_v39 = vpop.xlane.xlu1 %222  ;;  %v172_v41 = vmul.f32 %v164_v37, %v164_v37 }
 0x1f5   :  { %v237_v40 = vsub.f32 %v374_v28, %v223_v39  ;;  %v231_v46 = vmul.f32 %v223_v39, %v223_v39 }
 0x1f7   :  { %v170_v42 = vpop.xlane.xlu0 %169 }
 0x1f8   :  { %v174_v43 = vsub.f32 %v170_v42, %v172_v41  ;;  %v386_v44 = vpop.xlane.xlu1 %161 }
 0x1f9   :  { %v177_v45 = vsub.f32 %v365_v24, %v386_v44  ;;  %v171_v48 = vmul.f32 %v386_v44, %v386_v44 }
 0x1fa   :  { %v176_v47 = vmax.f32 %v174_v43, 0.0 }
 0x1fb   :  { %v229_v49 = vpop.xlane.xlu0 %228 }
 0x1fc   :  { %v180_v50 = vadd.f32 1e-05, %v176_v47  ;;  %v233_v51 = vsub.f32 %v229_v49, %v231_v46  ;;  %v168_v52 = vpop.xlane.xlu1 %167 }
 0x1fd   :  { %v173_v53 = vsub.f32 %v168_v52, %v171_v48 }
 0x1fe   :  { %301 = vrsqrt.f32 %v180_v50  ;;  %v235_v54 = vmax.f32 %v233_v51, 0.0 }
 0x1ff   :  { %v175_v55 = vmax.f32 %v173_v53, 0.0  ;;  %v221_v56 = vpop.xlane.xlu0 %220 }
 0x200   :  { %v239_v57 = vadd.f32 1e-05, %v235_v54  ;;  %v236_v58 = vsub.f32 %v367_v25, %v221_v56  ;;  %v230_v60 = vmul.f32 %v221_v56, %v221_v56 }
 0x201   :  { %v179_v59 = vadd.f32 1e-05, %v175_v55 }
 0x202   :  { %303 = vrsqrt.f32 %v239_v57 }
 0x203   :  { %v227_v61 = vpop.xlane.xlu0 %226  ;;  %305 = vrsqrt.f32 %v179_v59 }
 0x204   :  { %v232_v62 = vsub.f32 %v227_v61, %v230_v60 }
 0x206   :  { %v234_v63 = vmax.f32 %v232_v62, 0.0 }
 0x208   :  { %v302_v1 = vpop.eup %301  ;;  %v238_v2 = vadd.f32 1e-05, %v234_v63 }
 0x209   :  { %v184_v3 = vmul.f32 %v302_v1, %v152_v0 }
 0x20a   :  { %307 = vrsqrt.f32 %v238_v2 }
 0x20b   :  { %192 = vperm.xlu1 %289, %v184_v3  }
 0x20c   :  { %v304_v5 = vpop.eup %303 }
 0x20d   :  { %v243_v6 = vmul.f32 %v304_v5, %v152_v0  ;;  %v306_v8 = vpop.eup %305 }
 0x20e   :  { %v183_v10 = vmul.f32 %v306_v8, %v151_v9 }
 0x20f   :  { %291 = vset.pattern.permute.xlu1 %v321_v7  ;;  %251 = vperm.xlu0 %290, %v243_v6  }
 0x210   :  { %204 = vperm.xlu1 %291, %v152_v0  }
 0x214   :  { %v308_v11 = vpop.eup %307  ;;  %292 = vset.pattern.permute.xlu1 %v319_v4 }
 0x215   :  { %187 = vperm.xlu1 %292, %v183_v10   ;;  %v242_v12 = vmul.f32 %v308_v11, %v151_v9 }
 0x219   :  { %246 = vperm.xlu1 %292, %v242_v12  }
 0x21d   :  { %293 = vset.pattern.permute.xlu1 %v321_v7 }
 0x21e   :  { %199 = vperm.xlu1 %293, %v151_v9  }
 0x28a   :  { %v193_v13 = vpop.permute.xlu1 %192 }
 0x28b   :  { %v196_v14 = vmul.f32 %v193_v13, %v178_v38 }
 0x28e   :  { %v252_v15 = vpop.permute.xlu0 %251 }
 0x28f   :  { %v255_v16 = vmul.f32 %v252_v15, %v237_v40  ;;  %v205_v17 = vpop.permute.xlu1 %204 }
 0x290   :  { %v208_v18 = vadd.f32 %v205_v17, %v196_v14 }
 0x291   :  { %v257_v19 = vadd.f32 %v255_v16, %v205_v17 }
 0x292   :  { %v281_v20 = vmul.f32 -1.442695, %v208_v18 }
 0x293   :  { %v282_v21 = vmul.f32 -1.442695, %v257_v19 }
 0x294   :  { %309 = vpow2.f32 %v281_v20  ;;  %v188_v22 = vpop.permute.xlu1 %187 }
 0x295   :  { %311 = vpow2.f32 %v282_v21  ;;  %v195_v29 = vmul.f32 %v188_v22, %v177_v45 }
 0x298   :  { %v247_v27 = vpop.permute.xlu1 %246 }
 0x299   :  { %v254_v30 = vmul.f32 %v247_v27, %v236_v58 }
 0x29d   :  { %v200_v28 = vpop.permute.xlu1 %199 }
 0x29e   :  { %v310_v23 = vpop.eup %309  ;;  %v207_v31 = vadd.f32 %v200_v28, %v195_v29  ;;  %v256_v33 = vadd.f32 %v254_v30, %v200_v28 }
 0x29f   :  { %v312_v25 = vpop.eup %311  ;;  %v212_v4 = vadd.f32 1.0, %v310_v23 }
 0x2a0   :  { %v261_v26 = vadd.f32 1.0, %v312_v25 }
 0x2a1   :  { %313 = vrcp.f32 %v212_v4 }
 0x2a2   :  { %315 = vrcp.f32 %v261_v26 }
 0x2ab   :  { %v314_v32 = vpop.eup %313 }
 0x2ac   :  { %v316_v34 = vpop.eup %315  ;;  %v215_v35 = vmul.f32 %v314_v32, %v207_v31 }
 0x2ad   :  { %v264_v36 = vmul.f32 %v316_v34, %v256_v33 }
 0x2ae   :  { %v216_v37 = vpack.c.bf16 %v215_v35, %v215_v35 }
 0x2af   :  { %v265_v38 = vpack.c.bf16 %v264_v36, %v264_v36 }
 0x2b0   :  { %217 = vst [vmem:[%s413_s4] sm:$0xf] %v216_v37 }
 0x2b1   :  { %283 = vst [vmem:[%s413_s4 + $0x4] sm:$0xf] %v265_v38 }

</bundles_post_ra>
